<compile_context>
chip_gen: v5e
topology: v5e:2x2
jax: 0.10.0
libtpu: 0.0.40
codegen_flags: <defaults>
</compile_context>

<pallas_src>
import jax
import jax.numpy as jnp
from jax.experimental import pallas as pl
from jax.experimental.pallas import tpu as pltpu

# ----------------------------- module config ------------------------------
OUTPUT_DIM = 2
NUM_NODE_FEATS = 4
LATENT_DIM = [8]            # single GNN layer (latent_dim[-1] == sum(latent_dim))
K = 12                      # dynamic-pooling cap
CONV1D_CHANNELS = [16, 32]
KW0 = sum(LATENT_DIM)       # conv1d_kws[0] = total_latent_dim
KW1 = 5
N_NODES = 20                # > K so dynamic pooling truncates

D = LATENT_DIM[-1]
C1, C2 = CONV1D_CHANNELS
M = min(N_NODES, K)         # width after dynamic pooling
L1 = M - KW0 + 1            # width after conv1
L2 = L1 - KW1 + 1           # width after conv2
# fc in-features (= conv1d_channels[-1]) require conv2 output width == 1.
assert L2 == 1

LANE = 128                  # TPU lane width; every weight block is padded to it
IN_W = N_NODES * NUM_NODE_FEATS      # 80 : flattened per-graph input width
W_ROWS = 4 * LANE                    # 512: four packed (128,128) weight blocks
B_TILE = 256                         # graphs per grid step (sweep 256-1024)


# ------------------------------- kernel -----------------------------------
def dgcnn_kernel(x_ref, w_ref, out_ref):
    # x_ref : (B_TILE, 128)  bf16, one flattened graph per row, lane 127 == 1
    # w_ref : (512, 128)     bf16 packed weight blocks (biases folded in row 127),
    #                        constant index_map -> VMEM-resident across steps
    # out_ref: (B_TILE, 128) bf16 lane-dense output (cols >= OUTPUT_DIM unused)
    f32 = jnp.float32
    bf16 = jnp.bfloat16

    # GNN Linear (+bias via the constant-1 lane) + ReLU + dynamic pooling,
    # folded into one block-diagonal matmul.
    h = jnp.dot(x_ref[...], w_ref[0 * LANE:1 * LANE, :],
                preferred_element_type=f32)
    h = jnp.maximum(h, 0.0).astype(bf16)          # col 127 stays exactly 1

    # conv1d #1 as a single Toeplitz-unrolled matmul (+bias) + ReLU.
    z1 = jnp.dot(h, w_ref[1 * LANE:2 * LANE, :], preferred_element_type=f32)
    z1 = jnp.maximum(z1, 0.0).astype(bf16)

    # conv1d #2 (single output window) as a matmul (+bias) + ReLU.
    z2 = jnp.dot(z1, w_ref[2 * LANE:3 * LANE, :], preferred_element_type=f32)
    z2 = jnp.maximum(z2, 0.0).astype(bf16)

    # flatten (already flat) + final fc (+bias).
    out = jnp.dot(z2, w_ref[3 * LANE:4 * LANE, :], preferred_element_type=f32)
    out_ref[...] = out.astype(out_ref.dtype)


# --------------------------- host-side weight prep --------------------------
def init_params(key):
    ks = jax.random.split(key, 8)
    u = lambda k, shape, s: jax.random.uniform(k, shape, jnp.float32, -s, s)
    return {
        # nn.Linear(num_node_feats, D): weight (D, F), bias (D,)
        "wg": u(ks[0], (D, NUM_NODE_FEATS), 1.0 / jnp.sqrt(NUM_NODE_FEATS)),
        "bg": u(ks[1], (D,), 1.0 / jnp.sqrt(NUM_NODE_FEATS)),
        # nn.Conv1d(D, C1, KW0): weight (C1, D, KW0), bias (C1,)
        "w1": u(ks[2], (C1, D, KW0), 1.0 / jnp.sqrt(D * KW0)),
        "b1": u(ks[3], (C1,), 1.0 / jnp.sqrt(D * KW0)),
        # nn.Conv1d(C1, C2, KW1): weight (C2, C1, KW1), bias (C2,)
        "w2": u(ks[4], (C2, C1, KW1), 1.0 / jnp.sqrt(C1 * KW1)),
        "b2": u(ks[5], (C2,), 1.0 / jnp.sqrt(C1 * KW1)),
        # nn.Linear(C2, output_dim)
        "wfc": u(ks[6], (OUTPUT_DIM, C2), 1.0 / jnp.sqrt(C2)),
        "bfc": u(ks[7], (OUTPUT_DIM,), 1.0 / jnp.sqrt(C2)),
    }


def pack_params(params):
    """Fold the whole forward into 4 matmul blocks, biases folded into row 127
    of each block (driven by a constant-1 lane at column 127), packed into one
    lane-padded (512, 128) bf16 buffer.  Computed ONCE and cached."""
    f32 = jnp.float32

    def blk(w, bias, keep_one):
        # Zero-pad w (r,c) into a (128,128) block, put `bias` in row 127 and a
        # 1 at [127,127] so the constant-1 lane propagates to the next block.
        r, c = w.shape
        b = jnp.zeros((LANE, LANE), f32)
        b = b.at[:r, :c].set(w)
        b = b.at[LANE - 1, :bias.shape[0]].set(bias)
        if keep_one:
            b = b.at[LANE - 1, LANE - 1].set(1.0)
        return b

    # GNN linear (applied per node) + truncation to the first M nodes, as a
    # block-diagonal matrix:  h_flat = x_flat @ Ag,  Ag: (M*F, M*D); rows for
    # truncated nodes (and the padding lanes) are implicitly zero.
    wgT = params["wg"].T.astype(f32)                                   # (F, D)
    Ag = jnp.kron(jnp.eye(M, dtype=f32), wgT)                          # (M*F, M*D)
    bg_t = jnp.tile(params["bg"].astype(f32), M)                       # (M*D,)

    # conv1 unrolled over its L1 output positions:  A1[(t+j)*D+d, t*C1+c] = W1[c,d,j]
    A1 = jnp.zeros((M * D, L1 * C1), f32)
    w1 = params["w1"].astype(f32)                                      # (C1, D, KW0)
    for t in range(L1):
        for j in range(KW0):
            A1 = A1.at[(t + j) * D:(t + j + 1) * D,
                       t * C1:(t + 1) * C1].set(w1[:, :, j].T)
    b1_t = jnp.tile(params["b1"].astype(f32), L1)                      # (L1*C1,)

    # conv2 (single window):  A2[j*C1+c1, c2] = W2[c2, c1, j]
    A2 = params["w2"].astype(f32).transpose(2, 1, 0).reshape(KW1 * C1, C2)
    b2 = params["b2"].astype(f32)

    Afc = params["wfc"].T.astype(f32)                                  # (C2, OUT)
    bfc = params["bfc"].astype(f32)

    packed = jnp.concatenate(
        [blk(Ag, bg_t, True),
         blk(A1, b1_t, True),
         blk(A2, b2, True),
         blk(Afc, bfc, False)], axis=0)
    assert packed.shape == (W_ROWS, LANE)
    return packed.astype(jnp.bfloat16)            # bf16 MXU operands


# ------------------------------- wrapper -----------------------------------
@jax.jit
def dgcnn_forward(x_batch, w_packed, edge_index=None, edge_attr=None):
    """x_batch: (B, N_NODES, NUM_NODE_FEATS) -> (B, OUTPUT_DIM) f32."""
    del edge_index, edge_attr  # unused by the reference forward pass
    B = x_batch.shape[0]
    # Pad the batch to a multiple of B_TILE and to >= 2 grid steps so the
    # "parallel" axis can shard across v7x's 2 TensorCores.
    n_tiles = max(2, -(-B // B_TILE))
    B_pad = n_tiles * B_TILE

    # Lane-dense bf16 input: flatten, pad to 128 lanes, constant-1 lane 127.
    x_flat = x_batch.reshape(B, IN_W).astype(jnp.float32)
    x_lane = jnp.zeros((B_pad, LANE), jnp.float32)
    x_lane = x_lane.at[:B, :IN_W].set(x_flat)
    x_lane = x_lane.at[:, LANE - 1].set(1.0)       # bias-augmentation lane
    x_lane = x_lane.astype(jnp.bfloat16)

    cost = pl.CostEstimate(
        flops=2 * B_pad * 4 * LANE * LANE,
        transcendentals=0,
        bytes_accessed=(B_pad * LANE + W_ROWS * LANE + B_pad * LANE) * 2)

    out_padded = pl.pallas_call(
        dgcnn_kernel,
        out_shape=jax.ShapeDtypeStruct((B_pad, LANE), jnp.bfloat16),
        grid_spec=pltpu.PrefetchScalarGridSpec(
            num_scalar_prefetch=0,
            grid=(n_tiles,),
            in_specs=[
                pl.BlockSpec((B_TILE, LANE), lambda i: (i, 0)),   # graph tiles
                # Constant index_map: weights DMA'd once, stay VMEM-resident
                # (pipeline skips the copy when the block index is unchanged).
                pl.BlockSpec((W_ROWS, LANE), lambda i: (0, 0)),
            ],
            out_specs=pl.BlockSpec((B_TILE, LANE), lambda i: (i, 0)),
        ),
        compiler_params=pltpu.CompilerParams(
            dimension_semantics=("parallel",)),
        cost_estimate=cost,
    )(x_lane, w_packed)

    return out_padded[:B, :OUTPUT_DIM].astype(jnp.float32)


# --------------------------- pure-JAX reference -----------------------------
def dgcnn_reference(x_batch, params):
    def single(x):
        h = jnp.maximum(x @ params["wg"].T + params["bg"], 0.0)
        h = h[:M, :]                                   # dynamic pooling
        xin = h.T                                      # (D, M) == PyTorch NCW
        w1, b1 = params["w1"], params["b1"]
        z1 = jnp.stack([jnp.sum(w1 * xin[None, :, t:t + KW0], axis=(1, 2))
                        for t in range(L1)], axis=-1) + b1[:, None]   # (C1, L1)
        z1 = jnp.maximum(z1, 0.0)
        w2, b2 = params["w2"], params["b2"]
        z2 = jnp.maximum(jnp.sum(w2 * z1[None, :, :], axis=(1, 2)) + b2, 0.0)
        return z2 @ params["wfc"].T + params["bfc"]
    return jax.vmap(single)(x_batch)


# --------------------------------- main -------------------------------------
if __name__ == "__main__":
    key = jax.random.PRNGKey(0)
    k_x, k_p = jax.random.split(key)

    BATCH = 16                                   # graphs processed per call
    x = jax.random.normal(k_x, (BATCH, N_NODES, NUM_NODE_FEATS), jnp.float32)
    edge_index = jnp.zeros((2, 40), jnp.int32)   # accepted but unused by forward
    params = init_params(k_p)
    w_packed = pack_params(params)               # one-time host-side packing

    out = dgcnn_forward(x, w_packed, edge_index)
    out = jax.block_until_ready(out)

    ref = dgcnn_reference(x, params)
    assert out.shape == (BATCH, OUTPUT_DIM)
    # Tolerance loosened vs the previous f32 kernel: matmul operands are bf16
    # (f32 accumulation); measured error is ~1e-3, 2e-2 leaves margin.
    err = float(jnp.max(jnp.abs(out - ref)))
    assert err < 2e-2, (err, out, ref)
    print("KERNEL_OK")
</pallas_src>

<mosaic_0001>
module attributes {stable_mosaic.version = 11 : i64} {
  func.func @dgcnn_kernel(%arg0: i32, %arg1: memref<256x128xbf16, #tpu.memory_space<vmem>>, %arg2: memref<512x128xbf16, #tpu.memory_space<vmem>>, %arg3: memref<256x128xbf16, #tpu.memory_space<vmem>>) attributes {dimension_semantics = [#tpu.dimension_semantics<parallel>], iteration_bounds = array<i64: 2>, scalar_prefetch = 0 : i64, scratch_operands = 0 : i64, tpu.core_type = #tpu.core_type<tc>, window_params = [{transform_indices = @transform_0, window_bounds = array<i64: 256, 128>}, {pipeline_mode = #tpu.pipeline_mode<synchronous>, transform_indices = @transform_1, window_bounds = array<i64: 512, 128>}, {transform_indices = @transform_2, window_bounds = array<i64: 256, 128>}]} {
    %c0 = arith.constant 0 : index
    %c0_0 = arith.constant 0 : index
    %0 = vector.load %arg1[%c0, %c0_0] : memref<256x128xbf16, #tpu.memory_space<vmem>>, vector<256x128xbf16>
    %c0_1 = arith.constant 0 : index
    %c0_2 = arith.constant 0 : index
    %1 = vector.load %arg2[%c0_1, %c0_2] : memref<512x128xbf16, #tpu.memory_space<vmem>>, vector<128x128xbf16>
    %cst = arith.constant dense<0.000000e+00> : vector<256x128xf32>
    %2 = tpu.matmul %0, %1, %cst {dimension_numbers = #tpu.dot_dimension_numbers<[1], [0], [0], [1], [0, 0, 1, 1], [], []>} : vector<256x128xbf16>, vector<128x128xbf16>, vector<256x128xf32> -> vector<256x128xf32>
    %cst_3 = arith.constant 0.000000e+00 : f32
    %3 = vector.broadcast %cst_3 : f32 to vector<256x128xf32>
    %4 = arith.maximumf %2, %3 : vector<256x128xf32>
    %5 = arith.truncf %4 : vector<256x128xf32> to vector<256x128xbf16>
    %c128 = arith.constant 128 : index
    %c0_4 = arith.constant 0 : index
    %6 = vector.load %arg2[%c128, %c0_4] : memref<512x128xbf16, #tpu.memory_space<vmem>>, vector<128x128xbf16>
    %cst_5 = arith.constant dense<0.000000e+00> : vector<256x128xf32>
    %7 = tpu.matmul %5, %6, %cst_5 {dimension_numbers = #tpu.dot_dimension_numbers<[1], [0], [0], [1], [0, 0, 1, 1], [], []>} : vector<256x128xbf16>, vector<128x128xbf16>, vector<256x128xf32> -> vector<256x128xf32>
    %cst_6 = arith.constant 0.000000e+00 : f32
    %8 = vector.broadcast %cst_6 : f32 to vector<256x128xf32>
    %9 = arith.maximumf %7, %8 : vector<256x128xf32>
    %10 = arith.truncf %9 : vector<256x128xf32> to vector<256x128xbf16>
    %c256 = arith.constant 256 : index
    %c0_7 = arith.constant 0 : index
    %11 = vector.load %arg2[%c256, %c0_7] : memref<512x128xbf16, #tpu.memory_space<vmem>>, vector<128x128xbf16>
    %cst_8 = arith.constant dense<0.000000e+00> : vector<256x128xf32>
    %12 = tpu.matmul %10, %11, %cst_8 {dimension_numbers = #tpu.dot_dimension_numbers<[1], [0], [0], [1], [0, 0, 1, 1], [], []>} : vector<256x128xbf16>, vector<128x128xbf16>, vector<256x128xf32> -> vector<256x128xf32>
    %cst_9 = arith.constant 0.000000e+00 : f32
    %13 = vector.broadcast %cst_9 : f32 to vector<256x128xf32>
    %14 = arith.maximumf %12, %13 : vector<256x128xf32>
    %15 = arith.truncf %14 : vector<256x128xf32> to vector<256x128xbf16>
    %c384 = arith.constant 384 : index
    %c0_10 = arith.constant 0 : index
    %16 = vector.load %arg2[%c384, %c0_10] : memref<512x128xbf16, #tpu.memory_space<vmem>>, vector<128x128xbf16>
    %cst_11 = arith.constant dense<0.000000e+00> : vector<256x128xf32>
    %17 = tpu.matmul %15, %16, %cst_11 {dimension_numbers = #tpu.dot_dimension_numbers<[1], [0], [0], [1], [0, 0, 1, 1], [], []>} : vector<256x128xbf16>, vector<128x128xbf16>, vector<256x128xf32> -> vector<256x128xf32>
    %18 = arith.truncf %17 : vector<256x128xf32> to vector<256x128xbf16>
    %c0_12 = arith.constant 0 : index
    %c0_13 = arith.constant 0 : index
    %19 = vector.load %arg3[%c0_12, %c0_13] : memref<256x128xbf16, #tpu.memory_space<vmem>>, vector<256x128xbf16>
    tpu.vector_store %arg3[%c0_12, %c0_13], %18 {strides = array<i32>} : memref<256x128xbf16, #tpu.memory_space<vmem>>, vector<256x128xbf16>,
    return
  }
  func.func @transform_0(%arg0: i32) -> (i32, i32) {
    %c0_i32 = arith.constant 0 : i32
    %c0_i32_0 = arith.constant 0 : i32
    return %arg0, %c0_i32 : i32, i32
  }
  func.func @transform_1(%arg0: i32) -> (i32, i32) {
    %c0_i32 = arith.constant 0 : i32
    %c0_i32_0 = arith.constant 0 : i32
    %c0_i32_1 = arith.constant 0 : i32
    return %c0_i32, %c0_i32_0 : i32, i32
  }
  func.func @transform_2(%arg0: i32) -> (i32, i32) {
    %c0_i32 = arith.constant 0 : i32
    %c0_i32_0 = arith.constant 0 : i32
    return %arg0, %c0_i32 : i32, i32
  }
}

</mosaic_0001>

<bundles_post_ra>
// kernel: dgcnn_forward.1
= control target key start
LH: loop header
LB: loop body
LE: loop exit
PB: predicated region body
PF: predicated region fallthrough
CT: control target
= control target key end

     0   :  { %s1528_s9 = smov 0   ;;  %s1684_s0 = inlined_call_operand.vmem [shape: bf16[512,128], index: 0, kind: input, shape index: {}]   ;;  %s1685_s1 = inlined_call_operand.vmem [shape: bf16[512,128], index: 1, kind: input, shape index: {}]   ;;  %s1686_s2 = inlined_call_operand.vmem [shape: bf16[512,128], index: 2, kind: output, shape index: {}]  }
   0x1 LB: > { %s1151_s10 = sadd.s32 4294967295, %s1511_s9   ;;  %p1155_p0 = scmp.ge.s32.totalorder %s1511_s9, 1  ;;  %s1511_s9 = sphi %s1528_s9, %s12_s9  }
   0x2   : > { %p113_p1 = scmp.lt.s32.totalorder %s1511_s9, 3 }
   0x4   : > { %p114_p2 = pnand %p1155_p0, %p113_p1 }
   0x5   : > { %s1156_s19 = sshll.u32 (!%p114_p2), %s1151_s10, 5 }
   0x6   : > { %117 = sbr.rel (%p114_p2) target bundleno = 846 (0x34e), region = 28  ;;  %p136_p3 = scmp.lt.s32.totalorder (!%p114_p2), %s1156_s19, 63 }
   0xb   : > { %v1377_v0 = vld [vmem:[%s1685_s1 + $0x38] sm:$0xff]  ;;  %v1376_v1 = vld [vmem:[%s1685_s1 + $0x30] sm:$0xff]  ;;  %v1375_v2 = vld [vmem:[%s1685_s1 + $0x28] sm:$0xff]  ;;  %s1688_s19 = smov (!%p136_p3, %s1156_s19), 63 }
   0xc   : > { %339 = vmatpush.bf16.msra.mxu0 %v1377_v0  ;;  %v1374_v3 = vld [vmem:[%s1685_s1 + $0x20] sm:$0xff]  ;;  %v1373_v4 = vld [vmem:[%s1685_s1 + $0x18] sm:$0xff]  ;;  %v1372_v5 = vld [vmem:[%s1685_s1 + $0x10] sm:$0xff]  ;;  %s1157_s26 = sshll.u32 %s1688_s19, 2 }
   0xd   : > { %v1371_v6 = vld [vmem:[%s1685_s1 + $0x8] sm:$0xff]  ;;  %v1370_v7 = vld [vmem:[%s1685_s1] sm:$0xff]  ;;  %s1568_s3 = scalar_lea.vmem %s1684_s0, %s1157_s26  ;;  %v1385_v13 = vld [vmem:[%s1685_s1 + $0x78] sm:$0xff]  ;;  %s1663_s5 = scalar_lea.vmem %s1686_s2, %s1157_s26 }
   0xe   : > { %v1354_v8 = vld [vmem:[%s1568_s3] sm:$0xff]  ;;  %v1355_v9 = vld [vmem:[%s1568_s3 + $0x8] sm:$0xff]  ;;  %v1356_v10 = vld [vmem:[%s1568_s3 + $0x10] sm:$0xff]  ;;  %540 = vmatpush.bf16.msra.mxu1 %v1385_v13 }
   0xf   : > { %v1357_v11 = vld [vmem:[%s1568_s3 + $0x18] sm:$0xff]  ;;  %v1358_v12 = vld [vmem:[%s1568_s3 + $0x20] sm:$0xff]  ;;  %v1384_v14 = vld [vmem:[%s1685_s1 + $0x70] sm:$0xff] }
  0x10   : > { %340 = vmatpush.bf16.msra.mxu0 %v1376_v1  ;;  %v1359_v15 = vld [vmem:[%s1568_s3 + $0x28] sm:$0xff]  ;;  %v1382_v17 = vld [vmem:[%s1685_s1 + $0x60] sm:$0xff]  ;;  %v1381_v18 = vld [vmem:[%s1685_s1 + $0x58] sm:$0xff] }
  0x11   : > { %v1383_v16 = vld [vmem:[%s1685_s1 + $0x68] sm:$0xff]  ;;  %v1360_v19 = vld [vmem:[%s1568_s3 + $0x30] sm:$0xff]  ;;  %v1378_v22 = vld [vmem:[%s1685_s1 + $0x40] sm:$0xff] }
  0x12   : > { %541 = vmatpush.bf16.msra.mxu1 %v1384_v14  ;;  %v1380_v20 = vld [vmem:[%s1685_s1 + $0x50] sm:$0xff]  ;;  %v1379_v21 = vld [vmem:[%s1685_s1 + $0x48] sm:$0xff]  ;;  %v1361_v23 = vld [vmem:[%s1568_s3 + $0x38] sm:$0xff] }
  0x13   : > { %v1362_v24 = vld [vmem:[%s1568_s3 + $0x40] sm:$0xff]  ;;  %v1363_v30 = vld [vmem:[%s1568_s3 + $0x48] sm:$0xff]  ;;  %v1364_v36 = vld [vmem:[%s1568_s3 + $0x50] sm:$0xff] }
  0x14   : > { %341 = vmatpush.bf16.msra.mxu0 %v1375_v2  ;;  %v1365_v42 = vld [vmem:[%s1568_s3 + $0x58] sm:$0xff]  ;;  %v1366_v48 = vld [vmem:[%s1568_s3 + $0x60] sm:$0xff]  ;;  %v1367_v54 = vld [vmem:[%s1568_s3 + $0x68] sm:$0xff] }
  0x15   : > { %v1393_v56 = vld [vmem:[%s1685_s1 + $0xb8] sm:$0xff]  ;;  %v1392_v60 = vld [vmem:[%s1685_s1 + $0xb0] sm:$0xff]  ;;  %v1391_v62 = vld [vmem:[%s1685_s1 + $0xa8] sm:$0xff] }
  0x16   : > { %542 = vmatpush.bf16.msra.mxu1 %v1383_v16  ;;  %741 = vmatpush.bf16.msra.mxu2 %v1393_v56  ;;  %v1368_v63 = vld [vmem:[%s1568_s3 + $0x70] sm:$0xff]  ;;  %v1390_v1 = vld [vmem:[%s1685_s1 + $0xa0] sm:$0xff]  ;;  %v1389_v2 = vld [vmem:[%s1685_s1 + $0x98] sm:$0xff] }
  0x18   : > { %342 = vmatpush.bf16.msra.mxu0 %v1374_v3 }
  0x1a   : > { %543 = vmatpush.bf16.msra.mxu1 %v1382_v17  ;;  %742 = vmatpush.bf16.msra.mxu2 %v1392_v60 }
  0x1c   : > { %343 = vmatpush.bf16.msra.mxu0 %v1373_v4 }
  0x1e   : > { %544 = vmatpush.bf16.msra.mxu1 %v1381_v18  ;;  %743 = vmatpush.bf16.msra.mxu2 %v1391_v62 }
  0x20   : > { %344 = vmatpush.bf16.msra.mxu0 %v1372_v5 }
  0x22   : > { %545 = vmatpush.bf16.msra.mxu1 %v1380_v20  ;;  %744 = vmatpush.bf16.msra.mxu2 %v1390_v1 }
  0x24   : > { %345 = vmatpush.bf16.msra.mxu0 %v1371_v6  ;;  %v1388_v6 = vld [vmem:[%s1685_s1 + $0x90] sm:$0xff] }
  0x26   : > { %546 = vmatpush.bf16.msra.mxu1 %v1379_v21  ;;  %745 = vmatpush.bf16.msra.mxu2 %v1389_v2 }
  0x28   : > { %346 = vmatpush.bf16.msra.mxu0 %v1370_v7 }
  0x2a   : > { %547 = vmatpush.bf16.msra.mxu1 %v1378_v22  ;;  %746 = vmatpush.bf16.msra.mxu2 %v1388_v6 }
  0x2b   : > { %347 = vmatmul.bf16.vlgmr.msra.gmra.mxu0 %v1354_v8  ;;  %v1387_v8 = vld [vmem:[%s1685_s1 + $0x88] sm:$0xff] }
  0x2e   : > { %747 = vmatpush.bf16.msra.mxu2 %v1387_v8 }
  0x3b   : > { %352 = vmatmul.bf16.gmra.mxu0 %v1355_v9  ;;  %v1369_v9 = vld [vmem:[%s1568_s3 + $0x78] sm:$0xff] }
  0x4b   : > { %357 = vmatmul.bf16.gmra.mxu0 %v1356_v10 }
  0x5b   : > { %362 = vmatmul.bf16.gmra.mxu0 %v1357_v11  ;;  %v1386_v11 = vld [vmem:[%s1685_s1 + $0x80] sm:$0xff] }
  0x5c   : > { %748 = vmatpush.bf16.msra.mxu2 %v1386_v11 }
  0x6b   : > { %367 = vmatmul.bf16.gmra.mxu0 %v1358_v12 }
  0x7b   : > { %372 = vmatmul.bf16.gmra.mxu0 %v1359_v15 }
  0x8b   : > { %377 = vmatmul.bf16.gmra.mxu0 %v1360_v19 }
  0x9b   : > { %382 = vmatmul.bf16.gmra.mxu0 %v1361_v23 }
  0xa8   : > { %v348_v25 = vpop.f32.mrf.mxu0 }
  0xa9   : > { %v428_v27 = vmax.f32 %v348_v25, 0.0 }
  0xab   : > { %387 = vmatmul.bf16.gmra.mxu0 %v1362_v24 }
  0xb0   : > { %v350_v26 = vpop.f32.mrf.mxu0 }
  0xb1   : > { %v429_v28 = vmax.f32 %v350_v26, 0.0 }
  0xb3   : > { %v460_v29 = vpack.c.bf16 %v429_v28, %v428_v27 }
  0xb5   : > { %548 = vmatmul.bf16.vlgmr.msra.gmra.mxu1 %v460_v29 }
  0xb8   : > { %v353_v31 = vpop.f32.mrf.mxu0 }
  0xb9   : > { %v430_v33 = vmax.f32 %v353_v31, 0.0 }
  0xbb   : > { %392 = vmatmul.bf16.gmra.mxu0 %v1363_v30 }
  0xc0   : > { %v355_v32 = vpop.f32.mrf.mxu0 }
  0xc1   : > { %v431_v34 = vmax.f32 %v355_v32, 0.0 }
  0xc3   : > { %v461_v35 = vpack.c.bf16 %v431_v34, %v430_v33 }
  0xc5   : > { %553 = vmatmul.bf16.gmra.mxu1 %v461_v35 }
  0xc8   : > { %v358_v37 = vpop.f32.mrf.mxu0 }
  0xc9   : > { %v432_v39 = vmax.f32 %v358_v37, 0.0 }
  0xcb   : > { %397 = vmatmul.bf16.gmra.mxu0 %v1364_v36 }
  0xd0   : > { %v360_v38 = vpop.f32.mrf.mxu0 }
  0xd1   : > { %v433_v40 = vmax.f32 %v360_v38, 0.0 }
  0xd3   : > { %v462_v41 = vpack.c.bf16 %v433_v40, %v432_v39 }
  0xd5   : > { %558 = vmatmul.bf16.gmra.mxu1 %v462_v41 }
  0xd8   : > { %v363_v43 = vpop.f32.mrf.mxu0 }
  0xd9   : > { %v434_v45 = vmax.f32 %v363_v43, 0.0 }
  0xdb   : > { %402 = vmatmul.bf16.gmra.mxu0 %v1365_v42 }
  0xe0   : > { %v365_v44 = vpop.f32.mrf.mxu0 }
  0xe1   : > { %v435_v46 = vmax.f32 %v365_v44, 0.0 }
  0xe3   : > { %v463_v47 = vpack.c.bf16 %v435_v46, %v434_v45 }
  0xe5   : > { %563 = vmatmul.bf16.gmra.mxu1 %v463_v47 }
  0xe8   : > { %v368_v49 = vpop.f32.mrf.mxu0 }
  0xe9   : > { %v436_v51 = vmax.f32 %v368_v49, 0.0 }
  0xeb   : > { %407 = vmatmul.bf16.gmra.mxu0 %v1366_v48 }
  0xf0   : > { %v370_v50 = vpop.f32.mrf.mxu0 }
  0xf1   : > { %v437_v52 = vmax.f32 %v370_v50, 0.0 }
  0xf3   : > { %v464_v53 = vpack.c.bf16 %v437_v52, %v436_v51 }
  0xf5   : > { %568 = vmatmul.bf16.gmra.mxu1 %v464_v53 }
  0xf8   : > { %v373_v55 = vpop.f32.mrf.mxu0 }
  0xf9   : > { %v438_v58 = vmax.f32 %v373_v55, 0.0 }
  0xfb   : > { %412 = vmatmul.bf16.gmra.mxu0 %v1367_v54 }
 0x100   : > { %v375_v57 = vpop.f32.mrf.mxu0 }
 0x101   : > { %v439_v59 = vmax.f32 %v375_v57, 0.0 }
 0x103   : > { %v465_v61 = vpack.c.bf16 %v439_v59, %v438_v58 }
 0x105   : > { %573 = vmatmul.bf16.gmra.mxu1 %v465_v61 }
 0x108   : > { %v378_v0 = vpop.f32.mrf.mxu0 }
 0x109   : > { %v440_v4 = vmax.f32 %v378_v0, 0.0 }
 0x10b   : > { %417 = vmatmul.bf16.gmra.mxu0 %v1368_v63 }
 0x110   : > { %v380_v3 = vpop.f32.mrf.mxu0 }
 0x111   : > { %v441_v5 = vmax.f32 %v380_v3, 0.0 }
 0x113   : > { %v466_v7 = vpack.c.bf16 %v441_v5, %v440_v4 }
 0x115   : > { %578 = vmatmul.bf16.gmra.mxu1 %v466_v7 }
 0x118   : > { %v383_v10 = vpop.f32.mrf.mxu0 }
 0x119   : > { %v442_v13 = vmax.f32 %v383_v10, 0.0 }
 0x11b   : > { %422 = vmatmul.bf16.gmra.mxu0 %v1369_v9 }
 0x120   : > { %v385_v12 = vpop.f32.mrf.mxu0 }
 0x121   : > { %v443_v14 = vmax.f32 %v385_v12, 0.0 }
 0x123   : > { %v467_v15 = vpack.c.bf16 %v443_v14, %v442_v13  ;;  %v1401_v13 = vld [vmem:[%s1685_s1 + $0xf8] sm:$0xff] }
 0x124   : > { %942 = vmatpush.bf16.msra.mxu3 %v1401_v13 }
 0x125   : > { %583 = vmatmul.bf16.gmra.mxu1 %v467_v15 }
 0x128   : > { %v388_v16 = vpop.f32.mrf.mxu0 }
 0x129   : > { %v444_v18 = vmax.f32 %v388_v16, 0.0 }
 0x130   : > { %v390_v17 = vpop.f32.mrf.mxu0 }
 0x131   : > { %v445_v19 = vmax.f32 %v390_v17, 0.0 }
 0x132   : > { %v549_v20 = vpop.f32.mrf.mxu1 }
 0x133   : > { %v468_v21 = vpack.c.bf16 %v445_v19, %v444_v18  ;;  %v629_v24 = vmax.f32 %v549_v20, 0.0  ;;  %v1400_v18 = vld [vmem:[%s1685_s1 + $0xf0] sm:$0xff]  ;;  %v1399_v20 = vld [vmem:[%s1685_s1 + $0xe8] sm:$0xff] }
 0x134   : > { %943 = vmatpush.bf16.msra.mxu3 %v1400_v18 }
 0x135   : > { %588 = vmatmul.bf16.gmra.mxu1 %v468_v21 }
 0x138   : > { %v393_v22 = vpop.f32.mrf.mxu0  ;;  %944 = vmatpush.bf16.msra.mxu3 %v1399_v20 }
 0x139   : > { %v446_v28 = vmax.f32 %v393_v22, 0.0 }
 0x13a   : > { %v551_v23 = vpop.f32.mrf.mxu1 }
 0x13b   : > { %v630_v25 = vmax.f32 %v551_v23, 0.0  ;;  %v1398_v23 = vld [vmem:[%s1685_s1 + $0xe0] sm:$0xff] }
 0x13c   : > { %945 = vmatpush.bf16.msra.mxu3 %v1398_v23 }
 0x13d   : > { %v661_v26 = vpack.c.bf16 %v630_v25, %v629_v24 }
 0x13f   : > { %749 = vmatmul.bf16.vlgmr.msra.gmra.mxu2 %v661_v26 }
 0x140   : > { %v395_v27 = vpop.f32.mrf.mxu0 }
 0x141   : > { %v447_v29 = vmax.f32 %v395_v27, 0.0  ;;  %v1397_v27 = vld [vmem:[%s1685_s1 + $0xd8] sm:$0xff] }
 0x142   : > { %v554_v30 = vpop.f32.mrf.mxu1  ;;  %946 = vmatpush.bf16.msra.mxu3 %v1397_v27 }
 0x143   : > { %v469_v31 = vpack.c.bf16 %v447_v29, %v446_v28  ;;  %v631_v34 = vmax.f32 %v554_v30, 0.0 }
 0x145   : > { %593 = vmatmul.bf16.gmra.mxu1 %v469_v31 }
 0x148   : > { %v398_v32 = vpop.f32.mrf.mxu0 }
 0x149   : > { %v448_v38 = vmax.f32 %v398_v32, 0.0  ;;  %v1396_v32 = vld [vmem:[%s1685_s1 + $0xd0] sm:$0xff] }
 0x14a   : > { %v556_v33 = vpop.f32.mrf.mxu1  ;;  %947 = vmatpush.bf16.msra.mxu3 %v1396_v32 }
 0x14b   : > { %v632_v35 = vmax.f32 %v556_v33, 0.0 }
 0x14d   : > { %v662_v36 = vpack.c.bf16 %v632_v35, %v631_v34  ;;  %v1395_v34 = vld [vmem:[%s1685_s1 + $0xc8] sm:$0xff] }
 0x14e   : > { %948 = vmatpush.bf16.msra.mxu3 %v1395_v34 }
 0x14f   : > { %754 = vmatmul.bf16.gmra.mxu2 %v662_v36  ;;  %v1394_v36 = vld [vmem:[%s1685_s1 + $0xc0] sm:$0xff] }
 0x150   : > { %v400_v37 = vpop.f32.mrf.mxu0 }
 0x151   : > { %v449_v39 = vmax.f32 %v400_v37, 0.0 }
 0x152   : > { %v559_v40 = vpop.f32.mrf.mxu1  ;;  %949 = vmatpush.bf16.msra.mxu3 %v1394_v36 }
 0x153   : > { %v470_v41 = vpack.c.bf16 %v449_v39, %v448_v38  ;;  %v633_v44 = vmax.f32 %v559_v40, 0.0 }
 0x155   : > { %598 = vmatmul.bf16.gmra.mxu1 %v470_v41 }
 0x158   : > { %v403_v42 = vpop.f32.mrf.mxu0 }
 0x159   : > { %v450_v48 = vmax.f32 %v403_v42, 0.0 }
 0x15a   : > { %v561_v43 = vpop.f32.mrf.mxu1 }
 0x15b   : > { %v634_v45 = vmax.f32 %v561_v43, 0.0 }
 0x15d   : > { %v663_v46 = vpack.c.bf16 %v634_v45, %v633_v44 }
 0x15f   : > { %759 = vmatmul.bf16.gmra.mxu2 %v663_v46 }
 0x160   : > { %v405_v47 = vpop.f32.mrf.mxu0 }
 0x161   : > { %v451_v49 = vmax.f32 %v405_v47, 0.0 }
 0x162   : > { %v564_v50 = vpop.f32.mrf.mxu1 }
 0x163   : > { %v471_v51 = vpack.c.bf16 %v451_v49, %v450_v48  ;;  %v635_v54 = vmax.f32 %v564_v50, 0.0 }
 0x165   : > { %603 = vmatmul.bf16.gmra.mxu1 %v471_v51 }
 0x168   : > { %v408_v52 = vpop.f32.mrf.mxu0 }
 0x169   : > { %v452_v58 = vmax.f32 %v408_v52, 0.0 }
 0x16a   : > { %v566_v53 = vpop.f32.mrf.mxu1 }
 0x16b   : > { %v636_v55 = vmax.f32 %v566_v53, 0.0 }
 0x16d   : > { %v664_v56 = vpack.c.bf16 %v636_v55, %v635_v54 }
 0x16f   : > { %764 = vmatmul.bf16.gmra.mxu2 %v664_v56 }
 0x170   : > { %v410_v57 = vpop.f32.mrf.mxu0 }
 0x171   : > { %v453_v59 = vmax.f32 %v410_v57, 0.0 }
 0x172   : > { %v569_v60 = vpop.f32.mrf.mxu1 }
 0x173   : > { %v472_v61 = vpack.c.bf16 %v453_v59, %v452_v58  ;;  %v637_v0 = vmax.f32 %v569_v60, 0.0 }
 0x175   : > { %608 = vmatmul.bf16.gmra.mxu1 %v472_v61 }
 0x178   : > { %v413_v62 = vpop.f32.mrf.mxu0 }
 0x179   : > { %v454_v4 = vmax.f32 %v413_v62, 0.0 }
 0x17a   : > { %v571_v63 = vpop.f32.mrf.mxu1 }
 0x17b   : > { %v638_v1 = vmax.f32 %v571_v63, 0.0 }
 0x17d   : > { %v665_v2 = vpack.c.bf16 %v638_v1, %v637_v0 }
 0x17f   : > { %769 = vmatmul.bf16.gmra.mxu2 %v665_v2 }
 0x180   : > { %v415_v3 = vpop.f32.mrf.mxu0 }
 0x181   : > { %v455_v5 = vmax.f32 %v415_v3, 0.0 }
 0x182   : > { %v574_v6 = vpop.f32.mrf.mxu1 }
 0x183   : > { %v473_v7 = vpack.c.bf16 %v455_v5, %v454_v4  ;;  %v639_v10 = vmax.f32 %v574_v6, 0.0 }
 0x185   : > { %613 = vmatmul.bf16.gmra.mxu1 %v473_v7 }
 0x188   : > { %v418_v8 = vpop.f32.mrf.mxu0 }
 0x189   : > { %v456_v15 = vmax.f32 %v418_v8, 0.0 }
 0x18a   : > { %v576_v9 = vpop.f32.mrf.mxu1 }
 0x18b   : > { %v640_v11 = vmax.f32 %v576_v9, 0.0 }
 0x18d   : > { %v666_v12 = vpack.c.bf16 %v640_v11, %v639_v10 }
 0x18f   : > { %774 = vmatmul.bf16.gmra.mxu2 %v666_v12 }
 0x190   : > { %v420_v14 = vpop.f32.mrf.mxu0 }
 0x191   : > { %v457_v16 = vmax.f32 %v420_v14, 0.0 }
 0x192   : > { %v579_v17 = vpop.f32.mrf.mxu1 }
 0x193   : > { %v474_v19 = vpack.c.bf16 %v457_v16, %v456_v15  ;;  %v641_v24 = vmax.f32 %v579_v17, 0.0 }
 0x195   : > { %618 = vmatmul.bf16.gmra.mxu1 %v474_v19 }
 0x198   : > { %v423_v21 = vpop.f32.mrf.mxu0 }
 0x199   : > { %v458_v29 = vmax.f32 %v423_v21, 0.0 }
 0x19a   : > { %v581_v22 = vpop.f32.mrf.mxu1 }
 0x19b   : > { %v642_v25 = vmax.f32 %v581_v22, 0.0 }
 0x19d   : > { %v667_v26 = vpack.c.bf16 %v642_v25, %v641_v24 }
 0x19f   : > { %779 = vmatmul.bf16.gmra.mxu2 %v667_v26 }
 0x1a0   : > { %v425_v28 = vpop.f32.mrf.mxu0 }
 0x1a1   : > { %v459_v30 = vmax.f32 %v425_v28, 0.0 }
 0x1a2   : > { %v584_v31 = vpop.f32.mrf.mxu1 }
 0x1a3   : > { %v475_v33 = vpack.c.bf16 %v459_v30, %v458_v29  ;;  %v643_v37 = vmax.f32 %v584_v31, 0.0 }
 0x1a5   : > { %623 = vmatmul.bf16.gmra.mxu1 %v475_v33 }
 0x1aa   : > { %v586_v35 = vpop.f32.mrf.mxu1 }
 0x1ab   : > { %v644_v38 = vmax.f32 %v586_v35, 0.0 }
 0x1ad   : > { %v668_v39 = vpack.c.bf16 %v644_v38, %v643_v37 }
 0x1af   : > { %784 = vmatmul.bf16.gmra.mxu2 %v668_v39 }
 0x1b2   : > { %v589_v40 = vpop.f32.mrf.mxu1 }
 0x1b3   : > { %v645_v42 = vmax.f32 %v589_v40, 0.0 }
 0x1ba   : > { %v591_v41 = vpop.f32.mrf.mxu1 }
 0x1bb   : > { %v646_v43 = vmax.f32 %v591_v41, 0.0 }
 0x1bd   : > { %v669_v44 = vpack.c.bf16 %v646_v43, %v645_v42 }
 0x1bf   : > { %789 = vmatmul.bf16.gmra.mxu2 %v669_v44 }
 0x1c2   : > { %v594_v45 = vpop.f32.mrf.mxu1  ;;  %v750_v46 = vpop.f32.mrf.mxu2 }
 0x1c3   : > { %v647_v49 = vmax.f32 %v594_v45, 0.0  ;;  %v830_v50 = vmax.f32 %v750_v46, 0.0 }
 0x1ca   : > { %v596_v47 = vpop.f32.mrf.mxu1  ;;  %v752_v48 = vpop.f32.mrf.mxu2 }
 0x1cb   : > { %v648_v51 = vmax.f32 %v596_v47, 0.0  ;;  %v831_v52 = vmax.f32 %v752_v48, 0.0 }
 0x1cd   : > { %v670_v53 = vpack.c.bf16 %v648_v51, %v647_v49  ;;  %v862_v54 = vpack.c.bf16 %v831_v52, %v830_v50 }
 0x1cf   : > { %794 = vmatmul.bf16.gmra.mxu2 %v670_v53  ;;  %950 = vmatmul.bf16.vlgmr.msra.gmra.mxu3 %v862_v54 }
 0x1d2   : > { %v599_v55 = vpop.f32.mrf.mxu1  ;;  %v755_v56 = vpop.f32.mrf.mxu2 }
 0x1d3   : > { %v649_v59 = vmax.f32 %v599_v55, 0.0  ;;  %v832_v60 = vmax.f32 %v755_v56, 0.0 }
 0x1da   : > { %v601_v57 = vpop.f32.mrf.mxu1  ;;  %v757_v58 = vpop.f32.mrf.mxu2 }
 0x1db   : > { %v650_v61 = vmax.f32 %v601_v57, 0.0  ;;  %v833_v62 = vmax.f32 %v757_v58, 0.0 }
 0x1dd   : > { %v671_v63 = vpack.c.bf16 %v650_v61, %v649_v59  ;;  %v863_v0 = vpack.c.bf16 %v833_v62, %v832_v60 }
 0x1df   : > { %799 = vmatmul.bf16.gmra.mxu2 %v671_v63  ;;  %955 = vmatmul.bf16.gmra.mxu3 %v863_v0 }
 0x1e2   : > { %v604_v1 = vpop.f32.mrf.mxu1  ;;  %v760_v2 = vpop.f32.mrf.mxu2 }
 0x1e3   : > { %v651_v5 = vmax.f32 %v604_v1, 0.0  ;;  %v834_v6 = vmax.f32 %v760_v2, 0.0 }
 0x1ea   : > { %v606_v3 = vpop.f32.mrf.mxu1  ;;  %v762_v4 = vpop.f32.mrf.mxu2 }
 0x1eb   : > { %v652_v7 = vmax.f32 %v606_v3, 0.0  ;;  %v835_v8 = vmax.f32 %v762_v4, 0.0 }
 0x1ed   : > { %v672_v9 = vpack.c.bf16 %v652_v7, %v651_v5  ;;  %v864_v10 = vpack.c.bf16 %v835_v8, %v834_v6 }
 0x1ef   : > { %804 = vmatmul.bf16.gmra.mxu2 %v672_v9  ;;  %960 = vmatmul.bf16.gmra.mxu3 %v864_v10 }
 0x1f2   : > { %v609_v11 = vpop.f32.mrf.mxu1  ;;  %v765_v12 = vpop.f32.mrf.mxu2 }
 0x1f3   : > { %v653_v15 = vmax.f32 %v609_v11, 0.0  ;;  %v836_v16 = vmax.f32 %v765_v12, 0.0 }
 0x1fa   : > { %v611_v13 = vpop.f32.mrf.mxu1  ;;  %v767_v14 = vpop.f32.mrf.mxu2 }
 0x1fb   : > { %v654_v17 = vmax.f32 %v611_v13, 0.0  ;;  %v837_v18 = vmax.f32 %v767_v14, 0.0 }
 0x1fd   : > { %v673_v19 = vpack.c.bf16 %v654_v17, %v653_v15  ;;  %v865_v20 = vpack.c.bf16 %v837_v18, %v836_v16 }
 0x1ff   : > { %809 = vmatmul.bf16.gmra.mxu2 %v673_v19  ;;  %965 = vmatmul.bf16.gmra.mxu3 %v865_v20 }
 0x202   : > { %v614_v21 = vpop.f32.mrf.mxu1  ;;  %v770_v22 = vpop.f32.mrf.mxu2 }
 0x203   : > { %v655_v25 = vmax.f32 %v614_v21, 0.0  ;;  %v838_v26 = vmax.f32 %v770_v22, 0.0 }
 0x20a   : > { %v616_v23 = vpop.f32.mrf.mxu1  ;;  %v772_v24 = vpop.f32.mrf.mxu2 }
 0x20b   : > { %v656_v27 = vmax.f32 %v616_v23, 0.0  ;;  %v839_v28 = vmax.f32 %v772_v24, 0.0 }
 0x20d   : > { %v674_v29 = vpack.c.bf16 %v656_v27, %v655_v25  ;;  %v866_v30 = vpack.c.bf16 %v839_v28, %v838_v26 }
 0x20f   : > { %814 = vmatmul.bf16.gmra.mxu2 %v674_v29  ;;  %970 = vmatmul.bf16.gmra.mxu3 %v866_v30 }
 0x212   : > { %v619_v31 = vpop.f32.mrf.mxu1  ;;  %v775_v32 = vpop.f32.mrf.mxu2 }
 0x213   : > { %v657_v35 = vmax.f32 %v619_v31, 0.0  ;;  %v840_v36 = vmax.f32 %v775_v32, 0.0 }
 0x21a   : > { %v621_v33 = vpop.f32.mrf.mxu1  ;;  %v777_v34 = vpop.f32.mrf.mxu2 }
 0x21b   : > { %v658_v37 = vmax.f32 %v621_v33, 0.0  ;;  %v841_v38 = vmax.f32 %v777_v34, 0.0 }
 0x21d   : > { %v675_v39 = vpack.c.bf16 %v658_v37, %v657_v35  ;;  %v867_v40 = vpack.c.bf16 %v841_v38, %v840_v36 }
 0x21f   : > { %819 = vmatmul.bf16.gmra.mxu2 %v675_v39  ;;  %975 = vmatmul.bf16.gmra.mxu3 %v867_v40 }
 0x222   : > { %v624_v41 = vpop.f32.mrf.mxu1  ;;  %v780_v42 = vpop.f32.mrf.mxu2 }
 0x223   : > { %v659_v45 = vmax.f32 %v624_v41, 0.0  ;;  %v842_v46 = vmax.f32 %v780_v42, 0.0 }
 0x22a   : > { %v626_v43 = vpop.f32.mrf.mxu1  ;;  %v782_v44 = vpop.f32.mrf.mxu2 }
 0x22b   : > { %v660_v47 = vmax.f32 %v626_v43, 0.0  ;;  %v843_v48 = vmax.f32 %v782_v44, 0.0 }
 0x22d   : > { %v676_v49 = vpack.c.bf16 %v660_v47, %v659_v45  ;;  %v868_v50 = vpack.c.bf16 %v843_v48, %v842_v46 }
 0x22f   : > { %824 = vmatmul.bf16.gmra.mxu2 %v676_v49  ;;  %980 = vmatmul.bf16.gmra.mxu3 %v868_v50 }
 0x232   : > { %v785_v51 = vpop.f32.mrf.mxu2 }
 0x233   : > { %v844_v53 = vmax.f32 %v785_v51, 0.0 }
 0x23a   : > { %v787_v52 = vpop.f32.mrf.mxu2 }
 0x23b   : > { %v845_v54 = vmax.f32 %v787_v52, 0.0 }
 0x23d   : > { %v869_v55 = vpack.c.bf16 %v845_v54, %v844_v53 }
 0x23f   : > { %985 = vmatmul.bf16.gmra.mxu3 %v869_v55 }
 0x242   : > { %v790_v56 = vpop.f32.mrf.mxu2 }
 0x243   : > { %v846_v58 = vmax.f32 %v790_v56, 0.0 }
 0x24a   : > { %v792_v57 = vpop.f32.mrf.mxu2 }
 0x24b   : > { %v847_v59 = vmax.f32 %v792_v57, 0.0 }
 0x24d   : > { %v870_v60 = vpack.c.bf16 %v847_v59, %v846_v58 }
 0x24f   : > { %990 = vmatmul.bf16.gmra.mxu3 %v870_v60 }
 0x252   : > { %v795_v61 = vpop.f32.mrf.mxu2  ;;  %v951_v62 = vpop.f32.mrf.mxu3 }
 0x253   : > { %v848_v1 = vmax.f32 %v795_v61, 0.0 }
 0x25a   : > { %v797_v63 = vpop.f32.mrf.mxu2  ;;  %v953_v0 = vpop.f32.mrf.mxu3 }
 0x25b   : > { %v849_v2 = vmax.f32 %v797_v63, 0.0  ;;  %v1405_v3 = vpack.c.bf16 %v953_v0, %v951_v62 }
 0x25d   : > { %1406 = vst [vmem:[%s1663_s5] sm:$0xff] %v1405_v3   ;;  %v871_v4 = vpack.c.bf16 %v849_v2, %v848_v1 }
 0x25f   : > { %995 = vmatmul.bf16.gmra.mxu3 %v871_v4 }
 0x262   : > { %v800_v5 = vpop.f32.mrf.mxu2  ;;  %v956_v6 = vpop.f32.mrf.mxu3 }
 0x263   : > { %v850_v9 = vmax.f32 %v800_v5, 0.0 }
 0x26a   : > { %v802_v7 = vpop.f32.mrf.mxu2  ;;  %v958_v8 = vpop.f32.mrf.mxu3 }
 0x26b   : > { %v851_v10 = vmax.f32 %v802_v7, 0.0  ;;  %v1410_v11 = vpack.c.bf16 %v958_v8, %v956_v6 }
 0x26d   : > { %1482 = vst [vmem:[%s1663_s5 + $0x8] sm:$0xff] %v1410_v11   ;;  %v872_v12 = vpack.c.bf16 %v851_v10, %v850_v9 }
 0x26f   : > { %1000 = vmatmul.bf16.gmra.mxu3 %v872_v12 }
 0x272   : > { %v805_v13 = vpop.f32.mrf.mxu2  ;;  %v961_v14 = vpop.f32.mrf.mxu3 }
 0x273   : > { %v852_v17 = vmax.f32 %v805_v13, 0.0 }
 0x27a   : > { %v807_v15 = vpop.f32.mrf.mxu2  ;;  %v963_v16 = vpop.f32.mrf.mxu3 }
 0x27b   : > { %v853_v18 = vmax.f32 %v807_v15, 0.0  ;;  %v1415_v19 = vpack.c.bf16 %v963_v16, %v961_v14 }
 0x27d   : > { %1483 = vst [vmem:[%s1663_s5 + $0x10] sm:$0xff] %v1415_v19   ;;  %v873_v20 = vpack.c.bf16 %v853_v18, %v852_v17 }
 0x27f   : > { %1005 = vmatmul.bf16.gmra.mxu3 %v873_v20 }
 0x282   : > { %v810_v21 = vpop.f32.mrf.mxu2  ;;  %v966_v22 = vpop.f32.mrf.mxu3 }
 0x283   : > { %v854_v25 = vmax.f32 %v810_v21, 0.0 }
 0x28a   : > { %v812_v23 = vpop.f32.mrf.mxu2  ;;  %v968_v24 = vpop.f32.mrf.mxu3 }
 0x28b   : > { %v855_v26 = vmax.f32 %v812_v23, 0.0  ;;  %v1420_v27 = vpack.c.bf16 %v968_v24, %v966_v22 }
 0x28d   : > { %v874_v28 = vpack.c.bf16 %v855_v26, %v854_v25  ;;  %1484 = vst [vmem:[%s1663_s5 + $0x18] sm:$0xff] %v1420_v27  }
 0x28f   : > { %1010 = vmatmul.bf16.gmra.mxu3 %v874_v28 }
 0x292   : > { %v815_v29 = vpop.f32.mrf.mxu2  ;;  %v971_v30 = vpop.f32.mrf.mxu3 }
 0x293   : > { %v856_v33 = vmax.f32 %v815_v29, 0.0 }
 0x29a   : > { %v817_v31 = vpop.f32.mrf.mxu2  ;;  %v973_v32 = vpop.f32.mrf.mxu3 }
 0x29b   : > { %v857_v34 = vmax.f32 %v817_v31, 0.0  ;;  %v1425_v35 = vpack.c.bf16 %v973_v32, %v971_v30 }
 0x29d   : > { %v875_v36 = vpack.c.bf16 %v857_v34, %v856_v33  ;;  %1485 = vst [vmem:[%s1663_s5 + $0x20] sm:$0xff] %v1425_v35  }
 0x29f   : > { %1015 = vmatmul.bf16.gmra.mxu3 %v875_v36 }
 0x2a2   : > { %v820_v37 = vpop.f32.mrf.mxu2  ;;  %v976_v38 = vpop.f32.mrf.mxu3 }
 0x2a3   : > { %v858_v41 = vmax.f32 %v820_v37, 0.0 }
 0x2aa   : > { %v822_v39 = vpop.f32.mrf.mxu2  ;;  %v978_v40 = vpop.f32.mrf.mxu3 }
 0x2ab   : > { %v859_v42 = vmax.f32 %v822_v39, 0.0  ;;  %v1430_v43 = vpack.c.bf16 %v978_v40, %v976_v38 }
 0x2ad   : > { %v876_v44 = vpack.c.bf16 %v859_v42, %v858_v41  ;;  %1486 = vst [vmem:[%s1663_s5 + $0x28] sm:$0xff] %v1430_v43  }
 0x2af   : > { %1020 = vmatmul.bf16.gmra.mxu3 %v876_v44 }
 0x2b2   : > { %v825_v45 = vpop.f32.mrf.mxu2  ;;  %v981_v46 = vpop.f32.mrf.mxu3 }
 0x2b3   : > { %v860_v49 = vmax.f32 %v825_v45, 0.0 }
 0x2ba   : > { %v827_v47 = vpop.f32.mrf.mxu2  ;;  %v983_v48 = vpop.f32.mrf.mxu3 }
 0x2bb   : > { %v861_v50 = vmax.f32 %v827_v47, 0.0  ;;  %v1435_v51 = vpack.c.bf16 %v983_v48, %v981_v46 }
 0x2bd   : > { %v877_v52 = vpack.c.bf16 %v861_v50, %v860_v49  ;;  %1487 = vst [vmem:[%s1663_s5 + $0x30] sm:$0xff] %v1435_v51  }
 0x2bf   : > { %1025 = vmatmul.bf16.gmra.mxu3 %v877_v52 }
 0x2c2   : > { %v986_v53 = vpop.f32.mrf.mxu3 }
 0x2ca   : > { %v988_v54 = vpop.f32.mrf.mxu3 }
 0x2cb   : > { %v1440_v55 = vpack.c.bf16 %v988_v54, %v986_v53 }
 0x2cd   : > { %1488 = vst [vmem:[%s1663_s5 + $0x38] sm:$0xff] %v1440_v55  }
 0x2d2   : > { %v991_v56 = vpop.f32.mrf.mxu3 }
 0x2da   : > { %v993_v57 = vpop.f32.mrf.mxu3 }
 0x2db   : > { %v1445_v58 = vpack.c.bf16 %v993_v57, %v991_v56 }
 0x2dd   : > { %1489 = vst [vmem:[%s1663_s5 + $0x40] sm:$0xff] %v1445_v58  }
 0x2e2   : > { %v996_v59 = vpop.f32.mrf.mxu3 }
 0x2ea   : > { %v998_v60 = vpop.f32.mrf.mxu3 }
 0x2eb   : > { %v1450_v61 = vpack.c.bf16 %v998_v60, %v996_v59 }
 0x2ed   : > { %1490 = vst [vmem:[%s1663_s5 + $0x48] sm:$0xff] %v1450_v61  }
 0x2f2   : > { %v1001_v62 = vpop.f32.mrf.mxu3 }
 0x2fa   : > { %v1003_v63 = vpop.f32.mrf.mxu3 }
 0x2fb   : > { %v1455_v0 = vpack.c.bf16 %v1003_v63, %v1001_v62 }
 0x2fd   : > { %1491 = vst [vmem:[%s1663_s5 + $0x50] sm:$0xff] %v1455_v0  }
 0x302   : > { %v1006_v1 = vpop.f32.mrf.mxu3 }
 0x30a   : > { %v1008_v2 = vpop.f32.mrf.mxu3 }
 0x30b   : > { %v1460_v3 = vpack.c.bf16 %v1008_v2, %v1006_v1 }
 0x30d   : > { %1492 = vst [vmem:[%s1663_s5 + $0x58] sm:$0xff] %v1460_v3  }
 0x312   : > { %v1011_v4 = vpop.f32.mrf.mxu3 }
 0x31a   : > { %v1013_v5 = vpop.f32.mrf.mxu3 }
 0x31b   : > { %v1465_v6 = vpack.c.bf16 %v1013_v5, %v1011_v4 }
 0x31d   : > { %1493 = vst [vmem:[%s1663_s5 + $0x60] sm:$0xff] %v1465_v6  }
 0x322   : > { %v1016_v7 = vpop.f32.mrf.mxu3 }
 0x32a   : > { %v1018_v8 = vpop.f32.mrf.mxu3 }
 0x32b   : > { %v1470_v9 = vpack.c.bf16 %v1018_v8, %v1016_v7 }
 0x32d   : > { %1494 = vst [vmem:[%s1663_s5 + $0x68] sm:$0xff] %v1470_v9  }
 0x332   : > { %v1021_v10 = vpop.f32.mrf.mxu3 }
 0x33a   : > { %v1023_v11 = vpop.f32.mrf.mxu3 }
 0x33b   : > { %v1475_v12 = vpack.c.bf16 %v1023_v11, %v1021_v10 }
 0x33d   : > { %1495 = vst [vmem:[%s1663_s5 + $0x70] sm:$0xff] %v1475_v12  }
 0x342   : > { %v1026_v13 = vpop.f32.mrf.mxu3 }
 0x34a   : > { %v1028_v14 = vpop.f32.mrf.mxu3 }
 0x34b   : > { %v1480_v15 = vpack.c.bf16 %v1028_v14, %v1026_v13 }
 0x34d   : > { %1496 = vst [vmem:[%s1663_s5 + $0x78] sm:$0xff] %v1480_v15  }
 0x34e PF: > { %s12_s9 = sadd.s32 1, %s1511_s9  }
 0x34f   : > { %p9_p4 = scmp.ge.s32.totalorder %s12_s9, 4  }
 0x351   :  { %11 = sbr.rel (!%p9_p4) target bundleno = 1 (0x1), region = 58 }

</bundles_post_ra>
